<compile_context>
chip_gen: v5e
topology: v5e:2x2
jax: 0.10.0
libtpu: 0.0.40
codegen_flags: <defaults>
</compile_context>

<pallas_src>
import functools

import jax
import jax.numpy as jnp
from jax import lax
from jax.experimental import pallas as pl
from jax.experimental.pallas import tpu as pltpu

N_POINTS = 200          # `n_points` in the PyTorch code
P_PAD = 256             # per-level point axis padded to a multiple of 128
LABEL_LEVELS = 5
RGB_LEVELS = 6
RGB_LEVEL_DIM = 4
RGB_IN = RGB_LEVELS * RGB_LEVEL_DIM * 5   # 120
RGB_IN_PAD = 128        # rgb MLP input padded to 128 lanes
RGB_OUT_SUB = 8         # channel-major rgb output: 3 real channels on sublanes 0..2
LABEL_MAX_TILE = 1024   # rays per grid step, label head
RGB_MAX_TILE = 1024     # rays per grid step, rgb MLP


def _round_up(x, m):
    return (x + m - 1) // m * m


def _choose_tiling(n, max_tile):
    """Pad the ray count to a layout-friendly size and pick a tile that divides it.

    - small n: one full-extent block (sublane-aligned, no waste beyond 8).
    - moderate n: pad to a multiple of 128 (<=127 garbage rows) and prefer >=2
      grid blocks so dimension_semantics=("parallel",) can shard across both
      v7x TensorCores.
    - large n: pad to a multiple of max_tile so every step uses the full tile.
    """
    if n <= 128:
        n_pad = _round_up(max(n, 8), 8)
        return n_pad, n_pad
    if n >= 8 * max_tile:
        return _round_up(n, max_tile), max_tile
    n_pad = _round_up(n, 128)
    tile = min(max_tile, max(128, _round_up(n_pad // 2, 128)))
    while n_pad % tile:
        tile -= 128
    return n_pad, tile


# ---------------------------------------------------------------------------
# Plain-JAX glue: ray sampling + torch-ngp style multi-resolution grid encoder
# ---------------------------------------------------------------------------

_PRIMES = (1, 2654435761, 805459861)


def sample_points_along_ray(starts, ends):
    # TODO(synk): sample_points_along_ray source was not provided; we lerp the 2D
    # endpoints over N_POINTS samples and append the ray parameter t in [0,1] as
    # the third coordinate so the result is 3-D (GridEncoder input_dim=3).
    n = starts.shape[0]
    t = jnp.linspace(0.0, 1.0, N_POINTS, dtype=jnp.float32)                 # (P,)
    xy = starts[:, None, :] + (ends - starts)[:, None, :] * t[None, :, None]
    tz = jnp.broadcast_to(t[None, :, None], (n, N_POINTS, 1))
    return jnp.concatenate([xy, tz], axis=-1)                               # (N,P,3)


def make_grid_encoder(key, num_levels, level_dim, base_resolution,
                      log2_hashmap_size=14):
    tables, resolutions = [], []
    for lvl in range(num_levels):
        res = int(base_resolution * (2 ** lvl))
        size = min(res ** 3, 2 ** log2_hashmap_size)
        key, sub = jax.random.split(key)
        tables.append(jax.random.uniform(sub, (size, level_dim), jnp.float32,
                                         minval=-1e-4, maxval=1e-4))
        resolutions.append(res)
    return {"tables": tables, "resolutions": tuple(resolutions)}


def _grid_encode_levels(points, enc):
    # TODO(synk): GridEncoder source was not provided; this is a torch-ngp style
    # multi-resolution hash grid with trilinear interpolation, kept in plain JAX
    # (the hash-table gather has no clean Pallas TPU equivalent without a manual
    # DMA-gather kernel).
    outs = []
    for table, res in zip(enc["tables"], enc["resolutions"]):
        tsize = table.shape[0]
        pos = jnp.clip(points, 0.0, 1.0) * (res - 1)
        pos0 = jnp.floor(pos).astype(jnp.int32)
        frac = pos - pos0.astype(jnp.float32)
        feat = jnp.zeros(points.shape[:-1] + (table.shape[1],), jnp.float32)
        for corner in range(8):
            off = jnp.array([(corner >> d) & 1 for d in range(3)], dtype=jnp.int32)
            c = jnp.clip(pos0 + off, 0, res - 1)
            w = jnp.prod(jnp.where(off == 1, frac, 1.0 - frac), axis=-1)
            if res ** 3 <= tsize:                 # dense level
                idx = c[..., 0] + res * (c[..., 1] + res * c[..., 2])
            else:                                 # hashed level
                cu = c.astype(jnp.uint32)
                idx = (cu[..., 0] * jnp.uint32(_PRIMES[0])
                       ^ cu[..., 1] * jnp.uint32(_PRIMES[1])
                       ^ cu[..., 2] * jnp.uint32(_PRIMES[2]))
                idx = (idx % jnp.uint32(tsize)).astype(jnp.int32)
            feat = feat + table[idx] * w[..., None]
        outs.append(feat)
    return outs


def grid_encode(points, enc):
    return jnp.concatenate(_grid_encode_levels(points, enc), axis=-1)


def grid_encode_label_flat(points, enc):
    """(N, P, 3) -> (N, LABEL_LEVELS * P_PAD) bf16, level-major, lane-aligned.

    Level k occupies lanes [k*P_PAD, (k+1)*P_PAD); lanes >= N_POINTS inside
    each level are zero padding (masked inside the kernel). Built with a single
    concatenate so the lane padding costs no extra XLA pass.
    """
    feats = _grid_encode_levels(points, enc)            # list of (N, P, 1) f32
    n = points.shape[0]
    zpad = jnp.zeros((n, P_PAD - N_POINTS), jnp.bfloat16)
    pieces = []
    for f in feats:
        pieces.append(f[..., 0].astype(jnp.bfloat16))
        pieces.append(zpad)
    return jnp.concatenate(pieces, axis=-1)              # (N, 5*256) bf16


# ---------------------------------------------------------------------------
# Pallas kernel A: label head (Linear(5,1) + Sigmoid + max + first-hit argmax)
# ---------------------------------------------------------------------------

def _label_head_kernel(w_ref, b_ref, feat_ref, label_ref, hits_ref, idx_ref):
    tn = feat_ref.shape[0]
    # Linear(5 -> 1): z = b + sum_k w[k] * feat_level_k ; f32 accumulation
    # (v5e VPU/EUP have no bf16 path, so elementwise math stays f32).
    z = jnp.full((tn, P_PAD), b_ref[0], dtype=jnp.float32)
    for k in range(LABEL_LEVELS):                       # static lane slices
        lvl = feat_ref[:, k * P_PAD:(k + 1) * P_PAD].astype(jnp.float32)
        z = z + lvl * w_ref[k]
    # exact sigmoid: the kernel is HBM-bound, the divide is free in wall-clock.
    label = 1.0 / (1.0 + jnp.exp(-z))                   # (tn, P_PAD) f32
    label_ref[...] = label                              # lane-dense

    lane = lax.broadcasted_iota(jnp.int32, (tn, P_PAD), 1)
    valid = lane < N_POINTS                             # mask padded point lanes
    # max over real points (label >= 0 > -1, padded lanes can never win)
    hits_ref[...] = jnp.max(jnp.where(valid, label, -1.0), axis=1)[None, :]
    # torch.argmax over (label > 0.5): first hit index, 0 if no hit.
    # sigmoid(z) > 0.5  <=>  z > 0 (compare against z, not the transcendental).
    hit = jnp.logical_and(valid, z > 0.0)
    first = jnp.min(jnp.where(hit, lane, P_PAD), axis=1)
    idx_ref[...] = jnp.where(first == P_PAD, 0, first)[None, :]     # (1, tn)


def label_head(feat_flat, w, b, n_pad, tile_n):
    out_shapes = (
        jax.ShapeDtypeStruct((n_pad, P_PAD), jnp.float32),   # sigmoid labels
        jax.ShapeDtypeStruct((1, n_pad), jnp.float32),       # output_hits (lanes)
        jax.ShapeDtypeStruct((1, n_pad), jnp.int32),         # first-hit indices
    )
    return pl.pallas_call(
        _label_head_kernel,
        out_shape=out_shapes,
        grid=(n_pad // tile_n,),
        in_specs=[
            pl.BlockSpec(memory_space=pltpu.MemorySpace.SMEM),   # w (5,)
            pl.BlockSpec(memory_space=pltpu.MemorySpace.SMEM),   # b (1,)
            pl.BlockSpec((tile_n, LABEL_LEVELS * P_PAD), lambda i: (i, 0)),
        ],
        out_specs=(
            pl.BlockSpec((tile_n, P_PAD), lambda i: (i, 0)),
            pl.BlockSpec((1, tile_n), lambda i: (0, i)),
            pl.BlockSpec((1, tile_n), lambda i: (0, i)),
        ),
        compiler_params=pltpu.CompilerParams(dimension_semantics=("parallel",)),
    )(w, b, feat_flat)


# ---------------------------------------------------------------------------
# Pallas kernel B: rgb MLP  (120 -> 64 -> 64 -> 64 -> 3, bf16 MXU, f32 accum)
# Output is channel-major (8, tile_n): rays on lanes, RGB on sublanes 0..2.
# ---------------------------------------------------------------------------

def _rgb_mlp_kernel(x_ref, w1_ref, b1_ref, w2_ref, b2_ref, w3_ref, b3_ref,
                    w4t_ref, b4t_ref, out_ref):
    h = jnp.dot(x_ref[...], w1_ref[...], preferred_element_type=jnp.float32) + b1_ref[...]
    h = jnp.maximum(h, 0.0).astype(jnp.bfloat16)
    h = jnp.dot(h, w2_ref[...], preferred_element_type=jnp.float32) + b2_ref[...]
    h = jnp.maximum(h, 0.0).astype(jnp.bfloat16)
    h = jnp.dot(h, w3_ref[...], preferred_element_type=jnp.float32) + b3_ref[...]
    h = jnp.maximum(h, 0.0).astype(jnp.bfloat16)
    # Final 64 -> 3 layer computed channel-major: out[c, r] = sum_k w4t[c,k]*h[r,k]
    # (transposed-RHS matmul -> lane-dense (8, tile_n) writeback, ~16x fewer
    #  HBM bytes than a 128-wide f32 slab with only 3 real channels).
    out = lax.dot_general(w4t_ref[...], h, (((1,), (1,)), ((), ())),
                          preferred_element_type=jnp.float32)
    out_ref[...] = out + b4t_ref[...]


def rgb_mlp(x_pad, mlp_params, n_pad, tile_n):
    """x_pad: (n_pad, RGB_IN_PAD) bf16. Returns channel-major (8, n_pad) f32."""
    w1, b1, w2, b2, w3, b3, w4, b4 = mlp_params
    # zero-padded weight rows/cols leave results unchanged.
    w1p = jnp.pad(w1, ((0, RGB_IN_PAD - w1.shape[0]), (0, 0))).astype(jnp.bfloat16)
    w2b = w2.astype(jnp.bfloat16)
    w3b = w3.astype(jnp.bfloat16)
    w4t = jnp.pad(w4.T, ((0, RGB_OUT_SUB - w4.shape[1]), (0, 0))).astype(jnp.bfloat16)
    b4t = jnp.pad(b4.T, ((0, RGB_OUT_SUB - b4.shape[1]), (0, 0)))   # (8, 1) f32

    def full_spec(shape):
        return pl.BlockSpec(shape, lambda i, _s=len(shape): (0,) * _s)

    return pl.pallas_call(
        _rgb_mlp_kernel,
        out_shape=jax.ShapeDtypeStruct((RGB_OUT_SUB, n_pad), jnp.float32),
        grid=(n_pad // tile_n,),
        in_specs=[
            pl.BlockSpec((tile_n, RGB_IN_PAD), lambda i: (i, 0)),
            full_spec(w1p.shape), full_spec(b1.shape),
            full_spec(w2b.shape), full_spec(b2.shape),
            full_spec(w3b.shape), full_spec(b3.shape),
            full_spec(w4t.shape), full_spec(b4t.shape),
        ],
        out_specs=pl.BlockSpec((RGB_OUT_SUB, tile_n), lambda i: (0, i)),
        compiler_params=pltpu.CompilerParams(dimension_semantics=("parallel",)),
    )(x_pad, w1p, b1, w2b, b2, w3b, b3, w4t, b4t)


# ---------------------------------------------------------------------------
# Parameter init (deterministic, PyTorch-Linear-like uniform init)
# ---------------------------------------------------------------------------

def init_params(key):
    keys = jax.random.split(key, 8)
    enc_label = make_grid_encoder(keys[0], num_levels=LABEL_LEVELS, level_dim=1,
                                  base_resolution=8)
    enc_rgb = make_grid_encoder(keys[1], num_levels=RGB_LEVELS,
                                level_dim=RGB_LEVEL_DIM, base_resolution=4)

    def linear(k, fan_in, fan_out):
        k1, k2 = jax.random.split(k)
        lim = 1.0 / float(fan_in) ** 0.5
        w = jax.random.uniform(k1, (fan_in, fan_out), jnp.float32, -lim, lim)
        b = jax.random.uniform(k2, (1, fan_out), jnp.float32, -lim, lim)
        return w, b

    w_l, b_l = linear(keys[2], LABEL_LEVELS, 1)
    w1, b1 = linear(keys[3], RGB_IN, 64)
    w2, b2 = linear(keys[4], 64, 64)
    w3, b3 = linear(keys[5], 64, 64)
    w4, b4 = linear(keys[6], 64, 3)
    return {
        "encoder_label": enc_label,
        "encoder_rgb": enc_rgb,
        "w_label": w_l[:, 0],          # (5,)  -> SMEM
        "b_label": b_l[0],             # (1,)  -> SMEM
        "rgb_mlp": (w1, b1, w2, b2, w3, b3, w4, b4),
    }


# ---------------------------------------------------------------------------
# Full NgpNet forward
# ---------------------------------------------------------------------------

def ngp_net_forward(x, params):
    n = x.shape[0]
    n_pad, tile_label = _choose_tiling(n, LABEL_MAX_TILE)
    _, tile_rgb = _choose_tiling(n, RGB_MAX_TILE)

    # Pad the (tiny) ray parameters once up front so the big feature tensors are
    # born at n_pad rows and need no separate XLA pad pass before the kernels.
    xp = jnp.pad(x, ((0, n_pad - n), (0, 0))) if n_pad != n else x
    points = sample_points_along_ray(xp[:, :2], xp[:, 2:4])               # (Np,P,3)

    # --- label branch (Pallas kernel A) ---
    feat_flat = grid_encode_label_flat(points, params["encoder_label"])   # (Np,1280) bf16
    label_np, hits, idx_first = label_head(
        feat_flat, params["w_label"], params["b_label"], n_pad, tile_label)

    # --- rgb branch: encode ONLY the 5 gathered sample points per ray (matches
    #     the reference's clamp-to-[0, P-1] indexing but does 40x less encoder
    #     work than encoding all P points and gathering features) ---
    idx0 = idx_first[0]                                                    # (Np,)
    offsets = jnp.array([-2, -1, 0, 1, 2], jnp.int32)
    gidx = jnp.clip(idx0[:, None] + offsets[None, :], 0, N_POINTS - 1)     # (Np,5)
    pts5 = points[jnp.arange(n_pad)[:, None], gidx]                        # (Np,5,3)
    rgb_feat = grid_encode(pts5, params["encoder_rgb"])                    # (Np,5,24)
    gathered = jnp.concatenate(
        [rgb_feat.reshape(n_pad, RGB_IN),
         jnp.zeros((n_pad, RGB_IN_PAD - RGB_IN), jnp.float32)], axis=-1,
    ).astype(jnp.bfloat16)                                                 # (Np,128)
    rgb_cn = rgb_mlp(gathered, params["rgb_mlp"], n_pad, tile_rgb)         # (8,Np)

    output_hits = hits[0, :n, None]                                        # (N,1)
    output_label = label_np[:n, :N_POINTS, None]                           # (N,P,1)
    output_rgb = rgb_cn[:3, :n].T                                          # (N,3)
    return output_hits, output_label, output_rgb


# ---------------------------------------------------------------------------

if __name__ == "__main__":
    key = jax.random.PRNGKey(0)
    kp, kx = jax.random.split(key)
    params = init_params(kp)

    n_rays = 16
    # x = [start_x, start_y, end_x, end_y] per ray, in [0,1]
    x = jax.random.uniform(kx, (n_rays, 4), jnp.float32)

    fwd = jax.jit(functools.partial(ngp_net_forward, params=params))
    output_hits, output_label, output_rgb = fwd(x)
    jax.block_until_ready((output_hits, output_label, output_rgb))

    assert output_hits.shape == (n_rays, 1)
    assert output_label.shape == (n_rays, N_POINTS, 1)
    assert output_rgb.shape == (n_rays, 3)
    print("KERNEL_OK")
</pallas_src>

<mosaic_0001>
module attributes {stable_mosaic.version = 11 : i64} {
  func.func @_label_head_kernel(%arg0: i32, %arg1: memref<5xf32, #tpu.memory_space<smem>>, %arg2: memref<1xf32, #tpu.memory_space<smem>>, %arg3: memref<16x1280xbf16, #tpu.memory_space<vmem>>, %arg4: memref<16x256xf32, #tpu.memory_space<vmem>>, %arg5: memref<1x16xf32, #tpu.memory_space<vmem>>, %arg6: memref<1x16xi32, #tpu.memory_space<vmem>>) attributes {dimension_semantics = [#tpu.dimension_semantics<parallel>], iteration_bounds = array<i64: 1>, scalar_prefetch = 0 : i64, scratch_operands = 0 : i64, tpu.core_type = #tpu.core_type<tc>, window_params = [{transform_indices = @transform_0, window_bounds = array<i64: 5>}, {transform_indices = @transform_1, window_bounds = array<i64: 1>}, {transform_indices = @transform_2, window_bounds = array<i64: 16, 1280>}, {transform_indices = @transform_3, window_bounds = array<i64: 16, 256>}, {transform_indices = @transform_4, window_bounds = array<i64: 1, 16>}, {transform_indices = @transform_5, window_bounds = array<i64: 1, 16>}]} {
    %c0 = arith.constant 0 : index
    %0 = memref.load %arg2[%c0] : memref<1xf32, #tpu.memory_space<smem>>
    %1 = vector.broadcast %0 : f32 to vector<16x256xf32>
    %c0_0 = arith.constant 0 : index
    %c0_1 = arith.constant 0 : index
    %2 = vector.load %arg3[%c0_0, %c0_1] : memref<16x1280xbf16, #tpu.memory_space<vmem>>, vector<16x256xbf16>
    %3 = arith.extf %2 : vector<16x256xbf16> to vector<16x256xf32>
    %c0_2 = arith.constant 0 : index
    %4 = memref.load %arg1[%c0_2] : memref<5xf32, #tpu.memory_space<smem>>
    %5 = vector.broadcast %4 : f32 to vector<16x256xf32>
    %6 = arith.mulf %3, %5 : vector<16x256xf32>
    %7 = arith.addf %1, %6 : vector<16x256xf32>
    %c0_3 = arith.constant 0 : index
    %c256 = arith.constant 256 : index
    %8 = vector.load %arg3[%c0_3, %c256] : memref<16x1280xbf16, #tpu.memory_space<vmem>>, vector<16x256xbf16>
    %9 = arith.extf %8 : vector<16x256xbf16> to vector<16x256xf32>
    %c1 = arith.constant 1 : index
    %10 = memref.load %arg1[%c1] : memref<5xf32, #tpu.memory_space<smem>>
    %11 = vector.broadcast %10 : f32 to vector<16x256xf32>
    %12 = arith.mulf %9, %11 : vector<16x256xf32>
    %13 = arith.addf %7, %12 : vector<16x256xf32>
    %c0_4 = arith.constant 0 : index
    %c512 = arith.constant 512 : index
    %14 = vector.load %arg3[%c0_4, %c512] : memref<16x1280xbf16, #tpu.memory_space<vmem>>, vector<16x256xbf16>
    %15 = arith.extf %14 : vector<16x256xbf16> to vector<16x256xf32>
    %c2 = arith.constant 2 : index
    %16 = memref.load %arg1[%c2] : memref<5xf32, #tpu.memory_space<smem>>
    %17 = vector.broadcast %16 : f32 to vector<16x256xf32>
    %18 = arith.mulf %15, %17 : vector<16x256xf32>
    %19 = arith.addf %13, %18 : vector<16x256xf32>
    %c0_5 = arith.constant 0 : index
    %c768 = arith.constant 768 : index
    %20 = vector.load %arg3[%c0_5, %c768] : memref<16x1280xbf16, #tpu.memory_space<vmem>>, vector<16x256xbf16>
    %21 = arith.extf %20 : vector<16x256xbf16> to vector<16x256xf32>
    %c3 = arith.constant 3 : index
    %22 = memref.load %arg1[%c3] : memref<5xf32, #tpu.memory_space<smem>>
    %23 = vector.broadcast %22 : f32 to vector<16x256xf32>
    %24 = arith.mulf %21, %23 : vector<16x256xf32>
    %25 = arith.addf %19, %24 : vector<16x256xf32>
    %c0_6 = arith.constant 0 : index
    %c1024 = arith.constant 1024 : index
    %26 = vector.load %arg3[%c0_6, %c1024] : memref<16x1280xbf16, #tpu.memory_space<vmem>>, vector<16x256xbf16>
    %27 = arith.extf %26 : vector<16x256xbf16> to vector<16x256xf32>
    %c4 = arith.constant 4 : index
    %28 = memref.load %arg1[%c4] : memref<5xf32, #tpu.memory_space<smem>>
    %29 = vector.broadcast %28 : f32 to vector<16x256xf32>
    %30 = arith.mulf %27, %29 : vector<16x256xf32>
    %31 = arith.addf %25, %30 : vector<16x256xf32>
    %cst = arith.constant 0.000000e+00 : f32
    %32 = vector.broadcast %cst : f32 to vector<16x256xf32>
    %33 = arith.subf %32, %31 : vector<16x256xf32>
    %34 = math.exp %33 : vector<16x256xf32>
    %cst_7 = arith.constant 1.000000e+00 : f32
    %35 = vector.broadcast %cst_7 : f32 to vector<16x256xf32>
    %36 = arith.addf %35, %34 : vector<16x256xf32>
    %cst_8 = arith.constant 1.000000e+00 : f32
    %37 = vector.broadcast %cst_8 : f32 to vector<16x256xf32>
    %38 = arith.divf %37, %36 : vector<16x256xf32>
    %c0_9 = arith.constant 0 : index
    %c0_10 = arith.constant 0 : index
    %39 = vector.load %arg4[%c0_9, %c0_10] : memref<16x256xf32, #tpu.memory_space<vmem>>, vector<16x256xf32>
    tpu.vector_store %arg4[%c0_9, %c0_10], %38 {strides = array<i32>} : memref<16x256xf32, #tpu.memory_space<vmem>>, vector<16x256xf32>,
    %40 = tpu.iota {dimensions = array<i32: 1>} : vector<16x256xi32>
    %c200_i32 = arith.constant 200 : i32
    %41 = vector.broadcast %c200_i32 : i32 to vector<16x256xi32>
    %42 = arith.cmpi slt, %40, %41 : vector<16x256xi32>
    %cst_11 = arith.constant -1.000000e+00 : f32
    %43 = vector.broadcast %cst_11 : f32 to vector<16x256xf32>
    %44 = arith.select %42, %38, %43 : vector<16x256xi1>, vector<16x256xf32>
    %cst_12 = arith.constant dense<0xFF800000> : vector<16xf32>
    %45 = vector.multi_reduction <maximumf>, %44, %cst_12 [1] : vector<16x256xf32> to vector<16xf32>
    %46 = vector.shape_cast %45 : vector<16xf32> to vector<1x16xf32>
    %c0_13 = arith.constant 0 : index
    %c0_14 = arith.constant 0 : index
    %47 = vector.load %arg5[%c0_13, %c0_14] : memref<1x16xf32, #tpu.memory_space<vmem>>, vector<1x16xf32>
    tpu.vector_store %arg5[%c0_13, %c0_14], %46 {strides = array<i32>} : memref<1x16xf32, #tpu.memory_space<vmem>>, vector<1x16xf32>,
    %cst_15 = arith.constant 0.000000e+00 : f32
    %48 = vector.broadcast %cst_15 : f32 to vector<16x256xf32>
    %49 = arith.cmpf ogt, %31, %48 : vector<16x256xf32>
    %50 = arith.andi %42, %49 : vector<16x256xi1>
    %c256_i32 = arith.constant 256 : i32
    %51 = vector.broadcast %c256_i32 : i32 to vector<16x256xi32>
    %52 = arith.select %50, %40, %51 : vector<16x256xi1>, vector<16x256xi32>
    %cst_16 = arith.constant dense<2147483647> : vector<16xi32>
    %53 = vector.multi_reduction <minsi>, %52, %cst_16 [1] : vector<16x256xi32> to vector<16xi32>
    %c256_i32_17 = arith.constant 256 : i32
    %54 = vector.broadcast %c256_i32_17 : i32 to vector<16xi32>
    %55 = arith.cmpi eq, %53, %54 : vector<16xi32>
    %c0_i32 = arith.constant 0 : i32
    %56 = vector.broadcast %c0_i32 : i32 to vector<16xi32>
    %57 = arith.select %55, %56, %53 : vector<16xi1>, vector<16xi32>
    %58 = vector.shape_cast %57 : vector<16xi32> to vector<1x16xi32>
    %c0_18 = arith.constant 0 : index
    %c0_19 = arith.constant 0 : index
    %59 = vector.load %arg6[%c0_18, %c0_19] : memref<1x16xi32, #tpu.memory_space<vmem>>, vector<1x16xi32>
    tpu.vector_store %arg6[%c0_18, %c0_19], %58 {strides = array<i32>} : memref<1x16xi32, #tpu.memory_space<vmem>>, vector<1x16xi32>,
    return
  }
  func.func @transform_0(%arg0: i32) -> i32 {
    %c0_i32 = arith.constant 0 : i32
    %c0_i32_0 = arith.constant 0 : i32
    return %c0_i32 : i32
  }
  func.func @transform_1(%arg0: i32) -> i32 {
    %c0_i32 = arith.constant 0 : i32
    %c0_i32_0 = arith.constant 0 : i32
    return %c0_i32 : i32
  }
  func.func @transform_2(%arg0: i32) -> (i32, i32) {
    %c0_i32 = arith.constant 0 : i32
    %c0_i32_0 = arith.constant 0 : i32
    return %arg0, %c0_i32 : i32, i32
  }
  func.func @transform_3(%arg0: i32) -> (i32, i32) {
    %c0_i32 = arith.constant 0 : i32
    %c0_i32_0 = arith.constant 0 : i32
    return %arg0, %c0_i32 : i32, i32
  }
  func.func @transform_4(%arg0: i32) -> (i32, i32) {
    %c0_i32 = arith.constant 0 : i32
    %c0_i32_0 = arith.constant 0 : i32
    return %c0_i32, %arg0 : i32, i32
  }
  func.func @transform_5(%arg0: i32) -> (i32, i32) {
    %c0_i32 = arith.constant 0 : i32
    %c0_i32_0 = arith.constant 0 : i32
    return %c0_i32, %arg0 : i32, i32
  }
}

module attributes {stable_mosaic.version = 11 : i64} {
  func.func @_rgb_mlp_kernel(%arg0: i32, %arg1: memref<16x128xbf16, #tpu.memory_space<vmem>>, %arg2: memref<128x64xbf16, #tpu.memory_space<vmem>>, %arg3: memref<1x64xf32, #tpu.memory_space<vmem>>, %arg4: memref<64x64xbf16, #tpu.memory_space<vmem>>, %arg5: memref<1x64xf32, #tpu.memory_space<vmem>>, %arg6: memref<64x64xbf16, #tpu.memory_space<vmem>>, %arg7: memref<1x64xf32, #tpu.memory_space<vmem>>, %arg8: memref<8x64xbf16, #tpu.memory_space<vmem>>, %arg9: memref<8x1xf32, #tpu.memory_space<vmem>>, %arg10: memref<8x16xf32, #tpu.memory_space<vmem>>) attributes {dimension_semantics = [#tpu.dimension_semantics<parallel>], iteration_bounds = array<i64: 1>, scalar_prefetch = 0 : i64, scratch_operands = 0 : i64, tpu.core_type = #tpu.core_type<tc>, window_params = [{transform_indices = @transform_0, window_bounds = array<i64: 16, 128>}, {pipeline_mode = #tpu.pipeline_mode<synchronous>, transform_indices = @transform_1, window_bounds = array<i64: 128, 64>}, {pipeline_mode = #tpu.pipeline_mode<synchronous>, transform_indices = @transform_2, window_bounds = array<i64: 1, 64>}, {pipeline_mode = #tpu.pipeline_mode<synchronous>, transform_indices = @transform_3, window_bounds = array<i64: 64, 64>}, {pipeline_mode = #tpu.pipeline_mode<synchronous>, transform_indices = @transform_4, window_bounds = array<i64: 1, 64>}, {pipeline_mode = #tpu.pipeline_mode<synchronous>, transform_indices = @transform_5, window_bounds = array<i64: 64, 64>}, {pipeline_mode = #tpu.pipeline_mode<synchronous>, transform_indices = @transform_6, window_bounds = array<i64: 1, 64>}, {pipeline_mode = #tpu.pipeline_mode<synchronous>, transform_indices = @transform_7, window_bounds = array<i64: 8, 64>}, {pipeline_mode = #tpu.pipeline_mode<synchronous>, transform_indices = @transform_8, window_bounds = array<i64: 8, 1>}, {transform_indices = @transform_9, window_bounds = array<i64: 8, 16>}]} {
    %c0 = arith.constant 0 : index
    %c0_0 = arith.constant 0 : index
    %0 = vector.load %arg1[%c0, %c0_0] : memref<16x128xbf16, #tpu.memory_space<vmem>>, vector<16x128xbf16>
    %c0_1 = arith.constant 0 : index
    %c0_2 = arith.constant 0 : index
    %1 = vector.load %arg2[%c0_1, %c0_2] : memref<128x64xbf16, #tpu.memory_space<vmem>>, vector<128x64xbf16>
    %cst = arith.constant dense<0.000000e+00> : vector<16x64xf32>
    %2 = tpu.matmul %0, %1, %cst {dimension_numbers = #tpu.dot_dimension_numbers<[1], [0], [0], [1], [0, 0, 1, 1], [], []>} : vector<16x128xbf16>, vector<128x64xbf16>, vector<16x64xf32> -> vector<16x64xf32>
    %c0_3 = arith.constant 0 : index
    %c0_4 = arith.constant 0 : index
    %3 = vector.load %arg3[%c0_3, %c0_4] : memref<1x64xf32, #tpu.memory_space<vmem>>, vector<1x64xf32>
    %4 = vector.broadcast %3 : vector<1x64xf32> to vector<16x64xf32>
    %5 = arith.addf %2, %4 : vector<16x64xf32>
    %cst_5 = arith.constant 0.000000e+00 : f32
    %6 = vector.broadcast %cst_5 : f32 to vector<16x64xf32>
    %7 = arith.maximumf %5, %6 : vector<16x64xf32>
    %8 = arith.truncf %7 : vector<16x64xf32> to vector<16x64xbf16>
    %c0_6 = arith.constant 0 : index
    %c0_7 = arith.constant 0 : index
    %9 = vector.load %arg4[%c0_6, %c0_7] : memref<64x64xbf16, #tpu.memory_space<vmem>>, vector<64x64xbf16>
    %cst_8 = arith.constant dense<0.000000e+00> : vector<16x64xf32>
    %10 = tpu.matmul %8, %9, %cst_8 {dimension_numbers = #tpu.dot_dimension_numbers<[1], [0], [0], [1], [0, 0, 1, 1], [], []>} : vector<16x64xbf16>, vector<64x64xbf16>, vector<16x64xf32> -> vector<16x64xf32>
    %c0_9 = arith.constant 0 : index
    %c0_10 = arith.constant 0 : index
    %11 = vector.load %arg5[%c0_9, %c0_10] : memref<1x64xf32, #tpu.memory_space<vmem>>, vector<1x64xf32>
    %12 = vector.broadcast %11 : vector<1x64xf32> to vector<16x64xf32>
    %13 = arith.addf %10, %12 : vector<16x64xf32>
    %cst_11 = arith.constant 0.000000e+00 : f32
    %14 = vector.broadcast %cst_11 : f32 to vector<16x64xf32>
    %15 = arith.maximumf %13, %14 : vector<16x64xf32>
    %16 = arith.truncf %15 : vector<16x64xf32> to vector<16x64xbf16>
    %c0_12 = arith.constant 0 : index
    %c0_13 = arith.constant 0 : index
    %17 = vector.load %arg6[%c0_12, %c0_13] : memref<64x64xbf16, #tpu.memory_space<vmem>>, vector<64x64xbf16>
    %cst_14 = arith.constant dense<0.000000e+00> : vector<16x64xf32>
    %18 = tpu.matmul %16, %17, %cst_14 {dimension_numbers = #tpu.dot_dimension_numbers<[1], [0], [0], [1], [0, 0, 1, 1], [], []>} : vector<16x64xbf16>, vector<64x64xbf16>, vector<16x64xf32> -> vector<16x64xf32>
    %c0_15 = arith.constant 0 : index
    %c0_16 = arith.constant 0 : index
    %19 = vector.load %arg7[%c0_15, %c0_16] : memref<1x64xf32, #tpu.memory_space<vmem>>, vector<1x64xf32>
    %20 = vector.broadcast %19 : vector<1x64xf32> to vector<16x64xf32>
    %21 = arith.addf %18, %20 : vector<16x64xf32>
    %cst_17 = arith.constant 0.000000e+00 : f32
    %22 = vector.broadcast %cst_17 : f32 to vector<16x64xf32>
    %23 = arith.maximumf %21, %22 : vector<16x64xf32>
    %24 = arith.truncf %23 : vector<16x64xf32> to vector<16x64xbf16>
    %c0_18 = arith.constant 0 : index
    %c0_19 = arith.constant 0 : index
    %25 = vector.load %arg8[%c0_18, %c0_19] : memref<8x64xbf16, #tpu.memory_space<vmem>>, vector<8x64xbf16>
    %cst_20 = arith.constant dense<0.000000e+00> : vector<8x16xf32>
    %26 = tpu.matmul %25, %24, %cst_20 {dimension_numbers = #tpu.dot_dimension_numbers<[1], [1], [0], [0], [0, 0, 1, 0], [], []>} : vector<8x64xbf16>, vector<16x64xbf16>, vector<8x16xf32> -> vector<8x16xf32>
    %c0_21 = arith.constant 0 : index
    %c0_22 = arith.constant 0 : index
    %27 = vector.load %arg9[%c0_21, %c0_22] : memref<8x1xf32, #tpu.memory_space<vmem>>, vector<8x1xf32>
    %28 = vector.broadcast %27 : vector<8x1xf32> to vector<8x16xf32>
    %29 = arith.addf %26, %28 : vector<8x16xf32>
    %c0_23 = arith.constant 0 : index
    %c0_24 = arith.constant 0 : index
    %30 = vector.load %arg10[%c0_23, %c0_24] : memref<8x16xf32, #tpu.memory_space<vmem>>, vector<8x16xf32>
    tpu.vector_store %arg10[%c0_23, %c0_24], %29 {strides = array<i32>} : memref<8x16xf32, #tpu.memory_space<vmem>>, vector<8x16xf32>,
    return
  }
  func.func @transform_0(%arg0: i32) -> (i32, i32) {
    %c0_i32 = arith.constant 0 : i32
    %c0_i32_0 = arith.constant 0 : i32
    return %arg0, %c0_i32 : i32, i32
  }
  func.func @transform_1(%arg0: i32) -> (i32, i32) {
    %c0_i32 = arith.constant 0 : i32
    %c0_i32_0 = arith.constant 0 : i32
    %c0_i32_1 = arith.constant 0 : i32
    return %c0_i32, %c0_i32_0 : i32, i32
  }
  func.func @transform_2(%arg0: i32) -> (i32, i32) {
    %c0_i32 = arith.constant 0 : i32
    %c0_i32_0 = arith.constant 0 : i32
    %c0_i32_1 = arith.constant 0 : i32
    return %c0_i32, %c0_i32_0 : i32, i32
  }
  func.func @transform_3(%arg0: i32) -> (i32, i32) {
    %c0_i32 = arith.constant 0 : i32
    %c0_i32_0 = arith.constant 0 : i32
    %c0_i32_1 = arith.constant 0 : i32
    return %c0_i32, %c0_i32_0 : i32, i32
  }
  func.func @transform_4(%arg0: i32) -> (i32, i32) {
    %c0_i32 = arith.constant 0 : i32
    %c0_i32_0 = arith.constant 0 : i32
    %c0_i32_1 = arith.constant 0 : i32
    return %c0_i32, %c0_i32_0 : i32, i32
  }
  func.func @transform_5(%arg0: i32) -> (i32, i32) {
    %c0_i32 = arith.constant 0 : i32
    %c0_i32_0 = arith.constant 0 : i32
    %c0_i32_1 = arith.constant 0 : i32
    return %c0_i32, %c0_i32_0 : i32, i32
  }
  func.func @transform_6(%arg0: i32) -> (i32, i32) {
    %c0_i32 = arith.constant 0 : i32
    %c0_i32_0 = arith.constant 0 : i32
    %c0_i32_1 = arith.constant 0 : i32
    return %c0_i32, %c0_i32_0 : i32, i32
  }
  func.func @transform_7(%arg0: i32) -> (i32, i32) {
    %c0_i32 = arith.constant 0 : i32
    %c0_i32_0 = arith.constant 0 : i32
    %c0_i32_1 = arith.constant 0 : i32
    return %c0_i32, %c0_i32_0 : i32, i32
  }
  func.func @transform_8(%arg0: i32) -> (i32, i32) {
    %c0_i32 = arith.constant 0 : i32
    %c0_i32_0 = arith.constant 0 : i32
    %c0_i32_1 = arith.constant 0 : i32
    return %c0_i32, %c0_i32_0 : i32, i32
  }
  func.func @transform_9(%arg0: i32) -> (i32, i32) {
    %c0_i32 = arith.constant 0 : i32
    %c0_i32_0 = arith.constant 0 : i32
    return %c0_i32, %arg0 : i32, i32
  }
}

</mosaic_0001>

<bundles_post_ra>
// kernel: ngp_net_forward.2
= control target key start
LH: loop header
LB: loop body
LE: loop exit
PB: predicated region body
PF: predicated region fallthrough
CT: control target
= control target key end

     0   :  { %12 = vsyncpa [#allocation5], 0  ;;  %s498_s0 = inlined_call_operand.vmem [shape: f32[5], index: 0, kind: input, shape index: {}]   ;;  %s499_s1 = inlined_call_operand.<no memory space> [shape: f32[1], index: 1, kind: input, shape index: {}]   ;;  %s500_s2 = inlined_call_operand.vmem [shape: bf16[16,1280], index: 2, kind: input, shape index: {}]   ;;  %s501_s3 = inlined_call_operand.vmem [shape: f32[16,256], index: 3, kind: output, shape index: {0}]   ;;  %s502_s4 = inlined_call_operand.hbm [shape: f32[1,16], index: 4, kind: output, shape index: {1}]   ;;  %s503_s5 = inlined_call_operand.vmem [shape: s32[1,16], index: 5, kind: output, shape index: {2}]  }
   0x1   :  { %13 = vsyncpa [#allocation4], 0  ;;  %s19_s20 = sshll.u32 %s498_s0, 4  ;;  %s358_s21 = smov [#allocation3]   ;;  %s20_s20 = int_to_ptr.vmem [resolvable:$true] %s19_s20 }
   0x2   :  { %22 = dma.vmem_to_smem %s20_s20, 16, %s358_s21, [#allocation5]  }
   0x3   :  { %354 = dma.done.wait [#allocation5], 16  }
   0x4   :  { %355 = vsyncadd [#allocation5], 4294967280 }
   0x5   :  { %31 = sfence }
   0x6   :  { %v34_v0 = vld [vmem:[%s500_s2] sm:$0xff]  ;;  %s396_s24 = sld [smem:[#allocation3]]  ;;  %v50_v1 = vld [vmem:[%s500_s2 + $0x8] sm:$0xff]  ;;  %v66_v2 = vld [vmem:[%s500_s2 + $0x10] sm:$0xff]  ;;  %v194_v3 = vlaneseq  ;;  %v33_v4 = vstv %s499_s1  ;;  %s280_s6 = sshll.u32 %s502_s4, 4  ;;  %s281_s6 = int_to_ptr.hbm [resolvable:$true] %s280_s6 }
   0x7   :  { %v36_v5 = vunpack.c.l.bf16 %v34_v0  ;;  %s407_s30 = sld [smem:[#allocation3 + $0x1]]  ;;  %v82_v6 = vld [vmem:[%s500_s2 + $0x18] sm:$0xff]  ;;  %v98_v7 = vld [vmem:[%s500_s2 + $0x20] sm:$0xff]  ;;  %v35_v8 = vld [vmem:[%s500_s2 + $0x28] sm:$0xff]  ;;  %v37_v9 = vunpack.c.h.bf16 %v34_v0  ;;  %v52_v10 = vunpack.c.l.bf16 %v50_v1  ;;  %v53_v11 = vunpack.c.h.bf16 %v50_v1 }
   0x8   :  { %v68_v12 = vunpack.c.l.bf16 %v66_v2  ;;  %s297_s1 = sld [smem:[#allocation3 + $0x2]]  ;;  %v51_v13 = vld [vmem:[%s500_s2 + $0x30] sm:$0xff]  ;;  %v67_v14 = vld [vmem:[%s500_s2 + $0x38] sm:$0xff]  ;;  %v69_v15 = vunpack.c.h.bf16 %v66_v2  ;;  %v84_v16 = vunpack.c.l.bf16 %v82_v6  ;;  %v85_v17 = vunpack.c.h.bf16 %v82_v6  ;;  %v83_v19 = vld [vmem:[%s500_s2 + $0x40] sm:$0xff] }
   0x9   :  { %s298_s16 = sld [smem:[#allocation3 + $0x3]]  ;;  %v424_v18 = vand.u32 127, %v194_v3  ;;  %v100_v20 = vunpack.c.l.bf16 %v98_v7  ;;  %v101_v21 = vunpack.c.h.bf16 %v98_v7  ;;  %v38_v22 = vunpack.c.l.bf16 %v35_v8  ;;  %v99_v24 = vld [vmem:[%s500_s2 + $0x48] sm:$0xff] }
   0xa   :  { %s299_s19 = sld [smem:[#allocation3 + $0x4]]  ;;  %v39_v23 = vunpack.c.h.bf16 %v35_v8  ;;  %v54_v26 = vunpack.c.l.bf16 %v51_v13  ;;  %v55_v27 = vunpack.c.h.bf16 %v51_v13  ;;  %v70_v28 = vunpack.c.l.bf16 %v67_v14 }
   0xb   :  { %v433_v25 = vadd.s32 128, %v424_v18  ;;  %v71_v30 = vunpack.c.h.bf16 %v67_v14  ;;  %v86_v31 = vunpack.c.l.bf16 %v83_v19  ;;  %v87_v32 = vunpack.c.h.bf16 %v83_v19 }
   0xc   :  { %v41_v29 = vstv %s396_s24  ;;  %v102_v36 = vunpack.c.l.bf16 %v99_v24  ;;  %v103_v0 = vunpack.c.h.bf16 %v99_v24 }
   0xd   :  { %v42_v33 = vmul.f32 %v41_v29, %v36_v5  ;;  %v43_v34 = vmul.f32 %v41_v29, %v37_v9  ;;  %v57_v35 = vstv %s407_s30  ;;  %v44_v40 = vmul.f32 %v41_v29, %v38_v22 }
   0xe   :  { %v58_v37 = vmul.f32 %v57_v35, %v52_v10  ;;  %v59_v38 = vmul.f32 %v57_v35, %v53_v11  ;;  %v73_v39 = vstv %s297_s1  ;;  %v45_v47 = vmul.f32 %v41_v29, %v39_v23 }
   0xf   :  { %v46_v41 = vadd.f32 %v42_v33, %v33_v4  ;;  %v47_v42 = vadd.f32 %v43_v34, %v33_v4  ;;  %v74_v43 = vmul.f32 %v73_v39, %v68_v12  ;;  %v75_v44 = vmul.f32 %v73_v39, %v69_v15 }
  0x10   :  { %v89_v45 = vstv %s298_s16  ;;  %v105_v46 = vstv %s299_s19  ;;  %v48_v48 = vadd.f32 %v44_v40, %v33_v4  ;;  %v49_v55 = vadd.f32 %v45_v47, %v33_v4 }
  0x11   :  { %v62_v49 = vadd.f32 %v58_v37, %v46_v41  ;;  %v63_v50 = vadd.f32 %v59_v38, %v47_v42  ;;  %v90_v51 = vmul.f32 %v89_v45, %v84_v16  ;;  %v91_v52 = vmul.f32 %v89_v45, %v85_v17 }
  0x12   :  { %v106_v53 = vmul.f32 %v105_v46, %v100_v20  ;;  %v107_v54 = vmul.f32 %v105_v46, %v101_v21  ;;  %v60_v56 = vmul.f32 %v57_v35, %v54_v26  ;;  %v61_v59 = vmul.f32 %v57_v35, %v55_v27 }
  0x13   :  { %v78_v57 = vadd.f32 %v74_v43, %v62_v49  ;;  %v79_v58 = vadd.f32 %v75_v44, %v63_v50  ;;  %v76_v60 = vmul.f32 %v73_v39, %v70_v28  ;;  %v77_v62 = vmul.f32 %v73_v39, %v71_v30 }
  0x14   :  { %v64_v61 = vadd.f32 %v60_v56, %v48_v48  ;;  %v92_v63 = vmul.f32 %v89_v45, %v86_v31  ;;  %v65_v3 = vadd.f32 %v61_v59, %v49_v55  ;;  %v93_v6 = vmul.f32 %v89_v45, %v87_v32 }
  0x15   :  { %v94_v1 = vadd.f32 %v90_v51, %v78_v57  ;;  %v95_v2 = vadd.f32 %v91_v52, %v79_v58  ;;  %v108_v7 = vmul.f32 %v105_v46, %v102_v36  ;;  %vm198_vm0 = vcmp.lt.s32.totalorder %v433_v25, 200 }
  0x16   :  { %v80_v5 = vadd.f32 %v76_v60, %v64_v61  ;;  %v81_v4 = vadd.f32 %v77_v62, %v65_v3  ;;  %v109_v11 = vmul.f32 %v105_v46, %v103_v0 }
  0x17   :  { %v110_v8 = vadd.f32 %v106_v53, %v94_v1  ;;  %v111_v9 = vadd.f32 %v107_v54, %v95_v2 }
  0x18   :  { %v96_v10 = vadd.f32 %v92_v63, %v80_v5  ;;  %v97_v13 = vadd.f32 %v93_v6, %v81_v4 }
  0x19   :  { %vm219_vm1 = vcmp.gt.f32.partialorder %v110_v8, 0.0  ;;  %vm220_vm2 = vcmp.gt.f32.partialorder %v111_v9, 0.0  ;;  %v115_v27 = vsub.f32 0.0, %v111_v9  ;;  %v114_v28 = vsub.f32 0.0, %v110_v8 }
  0x1a   :  { %vm224_vm3 = vmand %vm198_vm0, %vm220_vm2  ;;  %v227_v12 = vsel %vm219_vm1, %v424_v18, 256  ;;  %v112_v14 = vadd.f32 %v108_v7, %v96_v10  ;;  %v113_v16 = vadd.f32 %v109_v11, %v97_v13 }
  0x1b   :  { %v228_v15 = vsel %vm224_vm3, %v433_v25, 256  ;;  %v120_v29 = vmul.f32 1.442695, %v115_v27  ;;  %v118_v30 = vmul.f32 1.442695, %v114_v28 }
  0x1c   :  { %vm231_vm4 = vcmp.lt.s32.totalorder %v227_v12, %v228_v15  ;;  %vm221_vm5 = vcmp.gt.f32.partialorder %v112_v14, 0.0  ;;  %vm222_vm6 = vcmp.gt.f32.partialorder %v113_v16, 0.0  ;;  %v116_v31 = vsub.f32 0.0, %v112_v14 }
  0x1d   :  { %v442_v17 = vsel %vm231_vm4, %v227_v12, %v228_v15  ;;  %v229_v20 = vsel %vm221_vm5, %v424_v18, 256  ;;  %vm226_vm7 = vmand %vm198_vm0, %vm222_vm6  ;;  %302 = vpow2.f32 %v120_v29  ;;  %v117_v32 = vsub.f32 0.0, %v113_v16 }
  0x1e   :  { %v234_v19 = vshra.s32 %v442_v17, 16  ;;  %v230_v22 = vsel %vm226_vm7, %v433_v25, 256  ;;  %304 = vpow2.f32 %v118_v30  ;;  %v122_v33 = vmul.f32 1.442695, %v116_v31 }
  0x1f   :  { %vm247_vm8 = vcmp.lt.s32.totalorder %v229_v20, %v230_v22  ;;  %v124_v34 = vmul.f32 1.442695, %v117_v32  ;;  %v233_v29 = vand.u32 65535, %v442_v17 }
  0x20   :  { %v446_v21 = vcvt.s32.f32 %v234_v19  ;;  %v452_v23 = vsel %vm247_vm8, %v229_v20, %v230_v22  ;;  %306 = vpow2.f32 %v122_v33 }
  0x21   :  { %v250_v24 = vshra.s32 %v452_v23, 16  ;;  %308 = vpow2.f32 %v124_v34  ;;  %v235_v30 = vcvt.s32.f32 %v233_v29  ;;  %v249_v33 = vand.u32 65535, %v452_v23 }
  0x22   :  { %237 = vmin.xlane.f32.xlu0 %v446_v21 }
  0x23   :  { %v455_v26 = vcvt.s32.f32 %v250_v24  ;;  %v303_v35 = vpop.eup %302  ;;  %v251_v34 = vcvt.s32.f32 %v249_v33 }
  0x24   :  { %v305_v36 = vpop.eup %304  ;;  %v127_v37 = vadd.f32 1.0, %v303_v35 }
  0x25   :  { %v126_v38 = vadd.f32 1.0, %v305_v36 }
  0x26   :  { %310 = vrcp.f32 %v127_v37  ;;  %v307_v39 = vpop.eup %306  ;;  %v156_v52 = vand.u32 2147483648, %v127_v37  ;;  %vm150_vm9 = vweird.f32 %v127_v37  ;;  %v154_v60 = vand.u32 2147483647, %v127_v37 }
  0x27   :  { %312 = vrcp.f32 %v126_v38  ;;  %v309_v40 = vpop.eup %308  ;;  %v128_v41 = vadd.f32 1.0, %v307_v39  ;;  %v141_v54 = vand.u32 2147483648, %v126_v38  ;;  %vm135_vm11 = vweird.f32 %v126_v38 }
  0x28   :  { %v458_v42 = vadd.f32 1.0, %v309_v40  ;;  %v139_v57 = vand.u32 2147483647, %v126_v38  ;;  %v157_v61 = vor.u32 1.1754944e-38, %v156_v52  ;;  %vm155_vm1 = vcmp.eq.f32.partialorder %v154_v60, 8.507059e+37 }
  0x29   :  { %314 = vrcp.f32 %v128_v41  ;;  %v142_v58 = vor.u32 1.1754944e-38, %v141_v54  ;;  %v171_v4 = vand.u32 2147483648, %v128_v41  ;;  %vm165_vm4 = vweird.f32 %v128_v41 }
  0x2a   :  { %253 = vmin.xlane.f32.xlu0 %v455_v26  ;;  %316 = vrcp.f32 %v458_v42  ;;  %vm140_vm15 = vcmp.eq.f32.partialorder %v139_v57, 8.507059e+37  ;;  %vm180_vm2 = vweird.f32 %v458_v42  ;;  %v184_v10 = vand.u32 2147483647, %v458_v42 }
  0x2b   :  { %v169_v12 = vand.u32 2147483647, %v128_v41  ;;  %v172_v13 = vor.u32 1.1754944e-38, %v171_v4  ;;  %v186_v15 = vand.u32 2147483648, %v458_v42 }
  0x2c   :  { %v311_v43 = vpop.eup %310 }
  0x2d   :  { %v313_v44 = vpop.eup %312  ;;  %v146_v45 = vmul.f32 %v311_v43, %v127_v37  ;;  %vm151_vm10 = vweird.f32 %v311_v43  ;;  %vm170_vm8 = vcmp.eq.f32.partialorder %v169_v12, 8.507059e+37  ;;  %v187_v22 = vor.u32 1.1754944e-38, %v186_v15 }
  0x2e   :  { %v131_v46 = vmul.f32 %v313_v44, %v126_v38  ;;  %vm136_vm12 = vweird.f32 %v313_v44  ;;  %vm152_vm13 = vmor %vm150_vm9, %vm151_vm10  ;;  %vm185_vm9 = vcmp.eq.f32.partialorder %v184_v10, 8.507059e+37  ;;  %v212_v37 = vadd.s32 4294967288, %v424_v18 }
  0x2f   :  { %v147_v47 = vsub.f32 1.0, %v146_v45  ;;  %v315_v50 = vpop.eup %314  ;;  %vm137_vm14 = vmor %vm135_vm11, %vm136_vm12  ;;  %vm217_vm12 = vcmask 122880  }
  0x30   :  { %v132_v48 = vsub.f32 1.0, %v131_v46  ;;  %v317_v53 = vpop.eup %316  ;;  %v161_v63 = vmul.f32 %v315_v50, %v128_v41  ;;  %vm166_vm5 = vweird.f32 %v315_v50 }
  0x31   :  { %v148_v49 = vmul.f32 %v311_v43, %v147_v47  ;;  %v176_v0 = vmul.f32 %v317_v53, %v458_v42  ;;  %vm181_vm3 = vweird.f32 %v317_v53  ;;  %vm167_vm7 = vmor %vm165_vm4, %vm166_vm5 }
  0x32   :  { %v133_v51 = vmul.f32 %v313_v44, %v132_v48  ;;  %v162_v3 = vsub.f32 1.0, %v161_v63  ;;  %vm182_vm6 = vmor %vm180_vm2, %vm181_vm3 }
  0x33   :  { %v149_v55 = vadd.f32 %v311_v43, %v148_v49  ;;  %v177_v5 = vsub.f32 1.0, %v176_v0 }
  0x34   :  { %v134_v56 = vadd.f32 %v313_v44, %v133_v51  ;;  %v163_v8 = vmul.f32 %v315_v50, %v162_v3 }
  0x35   :  { %v153_v59 = vsel %vm152_vm13, %v311_v43, %v149_v55  ;;  %v178_v9 = vmul.f32 %v317_v53, %v177_v5 }
  0x36   :  { %v138_v62 = vsel %vm137_vm14, %v313_v44, %v134_v56  ;;  %v158_v2 = vsel %vm155_vm1, %v157_v61, %v153_v59  ;;  %v164_v11 = vadd.f32 %v315_v50, %v163_v8 }
  0x37   :  { %v143_v1 = vsel %vm140_vm15, %v142_v58, %v138_v62  ;;  %191 = vst [vmem:[%s501_s3 + $0x8] sm:$0xff] %v158_v2  ;;  %v200_v6 = vsel %vm198_vm0, %v158_v2, -1.0  ;;  %v179_v14 = vadd.f32 %v317_v53, %v178_v9 }
  0x38   :  { %190 = vst [vmem:[%s501_s3] sm:$0xff] %v143_v1  ;;  %v203_v7 = vmax.f32 %v143_v1, %v200_v6  ;;  %v168_v16 = vsel %vm167_vm7, %v315_v50, %v164_v11 }
  0x39   :  { %v173_v19 = vsel %vm170_vm8, %v172_v13, %v168_v16  ;;  %v183_v20 = vsel %vm182_vm6, %v317_v53, %v179_v14 }
  0x3a   :  { %204 = vmax.xlane.f32.xlu2 %v203_v7  ;;  %192 = vst [vmem:[%s501_s3 + $0x10] sm:$0xff] %v173_v19  ;;  %v188_v24 = vsel %vm185_vm9, %v187_v22, %v183_v20 }
  0x3b   :  { %193 = vst [vmem:[%s501_s3 + $0x18] sm:$0xff] %v188_v24  ;;  %v202_v27 = vsel %vm198_vm0, %v188_v24, -1.0  ;;  %s359_s3 = smov [#allocation6]   ;;  %vm214_vm0 = vcmask 130112  }
  0x3c   :  { %v206_v28 = vmax.f32 %v173_v19, %v202_v27  ;;  %s278_s0 = sshll.u32 %s359_s3, 4  ;;  %s279_s0 = int_to_ptr.vmem [resolvable:$true] %s278_s0 }
  0x42   :  { %207 = vmax.xlane.f32.xlu2 %v206_v28 }
  0x95   :  { %v238_v31 = vpop.xlane.xlu0 %237 }
  0x96   :  { %vm239_vm10 = vcmp.eq.f32.partialorder %v446_v21, %v238_v31 }
  0x97   :  { %v240_v32 = vsel %vm239_vm10, %v235_v30, inf }
  0x98   :  { %241 = vmin.xlane.f32.xlu1 %v240_v32 }
  0x9d   :  { %v254_v35 = vpop.xlane.xlu0 %253 }
  0x9e   :  { %vm255_vm11 = vcmp.eq.f32.partialorder %v455_v26, %v254_v35  ;;  %v244_v26 = vcvt.f32.s32 %v238_v31  ;;  %v260_v42 = vcvt.f32.s32 %v254_v35 }
  0x9f   :  { %v256_v36 = vsel %vm255_vm11, %v251_v34, inf }
  0xa0   :  { %257 = vmin.xlane.f32.xlu1 %v256_v36  ;;  %v245_v41 = vshll.u32 %v244_v26, 16  ;;  %v261_v45 = vshll.u32 %v260_v42, 16 }
  0xad   :  { %v205_v25 = vpop.xlane.xlu2 %204 }
  0xae   :  { %v211_v38 = vperm.slane %v205_v25, %v424_v18 }
  0xb5   :  { %v208_v17 = vpop.xlane.xlu2 %207 }
  0xb6   :  { %v213_v21 = vperm.slane %v208_v17, %v212_v37 }
  0xb8   :  { %v215_v23 = vsel %vm214_vm0, %v213_v21, %v211_v38 }
  0xb9   :  { %218 = vst.msk [vmem:[#allocation6] sm:$0x1] %vm217_vm12, %v215_v23 }
  0xba   :  { %283 = dma.vmem_to_hbm [thread:$0]  %s279_s0, 16, %s281_s6, [#allocation4]  }
 0x10b   :  { %v242_v39 = vpop.xlane.xlu1 %241 }
 0x10c   :  { %v243_v40 = vcvt.f32.s32 %v242_v39 }
 0x10e   :  { %v246_v43 = vadd.s32 %v245_v41, %v243_v40 }
 0x110   :  { %vm263_vm13 = vcmp.eq.s32.totalorder %v246_v43, 256 }
 0x111   :  { %v265_v48 = vsel %vm263_vm13, 0, %v246_v43 }
 0x112   :  { %v267_v50 = vperm.slane %v265_v48, %v424_v18 }
 0x113   :  { %v258_v44 = vpop.xlane.xlu1 %257 }
 0x114   :  { %v259_v46 = vcvt.f32.s32 %v258_v44 }
 0x116   :  { %v262_v47 = vadd.s32 %v261_v45, %v259_v46 }
 0x118   :  { %vm264_vm14 = vcmp.eq.s32.totalorder %v262_v47, 256 }
 0x119   :  { %v266_v49 = vsel %vm264_vm14, 0, %v262_v47 }
 0x11a   :  { %v268_v51 = vperm.slane %v266_v49, %v212_v37 }
 0x11c   :  { %v269_v52 = vsel %vm214_vm0, %v268_v51, %v267_v50 }
 0x11d   :  { %270 = vst.msk [vmem:[%s503_s5] sm:$0x1] %vm217_vm12, %v269_v52 }
 0x11e   :  { %356 = dma.done.wait [#allocation4], 16  }
 0x11f   :  { %357 = vsyncadd [#allocation4], 4294967280 }
 0x120   :  { %294 = vsyncpa [#allocation4], 1 }
 0x121   :  { %295 = vsyncpa [#allocation5], 1 }

// kernel: ngp_net_forward.3
= control target key start
LH: loop header
LB: loop body
LE: loop exit
PB: predicated region body
PF: predicated region fallthrough
CT: control target
= control target key end

     0   :  { %vm162_vm0 = vcmask 523264   ;;  %v364_v34 = vmov 0   ;;  %vm265_vm1 = vcmask 130048   ;;  %s488_s1 = inlined_call_operand.vmem [shape: bf16[128,64], index: 1, kind: input, shape index: {}]   ;;  %s489_s2 = inlined_call_operand.vmem [shape: f32[1,64], index: 2, kind: input, shape index: {}]   ;;  %s490_s0 = inlined_call_operand.vmem [shape: bf16[16,128], index: 0, kind: input, shape index: {}]   ;;  %s491_s4 = inlined_call_operand.vmem [shape: f32[1,64], index: 4, kind: input, shape index: {}]   ;;  %s492_s3 = inlined_call_operand.vmem [shape: bf16[64,64], index: 3, kind: input, shape index: {}]   ;;  %s493_s6 = inlined_call_operand.vmem [shape: f32[1,64], index: 6, kind: input, shape index: {}]   ;;  %s494_s5 = inlined_call_operand.vmem [shape: bf16[64,64], index: 5, kind: input, shape index: {}]   ;;  %s495_s8 = inlined_call_operand.vmem [shape: f32[8,1], index: 8, kind: input, shape index: {}]   ;;  %s496_s7 = inlined_call_operand.vmem [shape: bf16[8,64], index: 7, kind: input, shape index: {}]   ;;  %s497_s9 = inlined_call_operand.vmem [shape: f32[8,16], index: 9, kind: output, shape index: {}]  }
   0x1   :  { %v350_v0 = vld [vmem:[%s488_s1 + $0x38] sm:$0xff]  ;;  %v349_v1 = vld [vmem:[%s488_s1 + $0x30] sm:$0xff]  ;;  %v348_v2 = vld [vmem:[%s488_s1 + $0x28] sm:$0xff]  ;;  %360 = vset.pattern.permute.xlu0 %v364_v34 }
   0x2   :  { %109 = vmatpush.bf16.msra.mxu0 %v350_v0  ;;  %v347_v3 = vld [vmem:[%s488_s1 + $0x20] sm:$0xff]  ;;  %v346_v4 = vld [vmem:[%s488_s1 + $0x18] sm:$0xff]  ;;  %v345_v5 = vld [vmem:[%s488_s1 + $0x10] sm:$0xff] }
   0x3   :  { %v344_v6 = vld [vmem:[%s488_s1 + $0x8] sm:$0xff]  ;;  %v343_v7 = vld [vmem:[%s488_s1] sm:$0xff]  ;;  %v354_v9 = vld [vmem:[%s492_s3 + $0x18] sm:$0xff] }
   0x4   :  { %v342_v8 = vld [vmem:[%s490_s0] sm:$0xff]  ;;  %170 = vmatpush.bf16.msra.mxu1 %v354_v9  ;;  %v353_v10 = vld [vmem:[%s492_s3 + $0x10] sm:$0xff]  ;;  %v352_v11 = vld [vmem:[%s492_s3 + $0x8] sm:$0xff] }
   0x5   :  { %v351_v12 = vld [vmem:[%s492_s3] sm:$0xff]  ;;  %v358_v21 = vld [vmem:[%s494_s5 + $0x18] sm:$0xff]  ;;  %v357_v22 = vld [vmem:[%s494_s5 + $0x10] sm:$0xff] }
   0x6   :  { %110 = vmatpush.bf16.msra.mxu0 %v349_v1  ;;  %v361_v14 = vld [vmem:[%s489_s2] ss:$0 sm:$0xff]  ;;  %226 = vmatpush.bf16.msra.mxu2 %v358_v21  ;;  %v356_v23 = vld [vmem:[%s494_s5 + $0x8] sm:$0xff] }
   0x7   :  { %v355_v24 = vld [vmem:[%s494_s5] sm:$0xff] }
   0x8   :  { %171 = vmatpush.bf16.msra.mxu1 %v353_v10  ;;  %v362_v26 = vld [vmem:[%s491_s4] ss:$0 sm:$0xff] }
   0x9   :  { %v240_v33 = vld [vmem:[%s495_s8] sm:$0xff] }
   0xa   :  { %111 = vmatpush.bf16.msra.mxu0 %v348_v2  ;;  %227 = vmatpush.bf16.msra.mxu2 %v357_v22  ;;  %v363_v36 = vld [vmem:[%s493_s6] ss:$0 sm:$0xff] }
   0xb   :  { %243 = vperm.xlu0 %360, %v240_v33   ;;  %v239_v44 = vld [vmem:[%s496_s7] sm:$0xf] }
   0xc   :  { %172 = vmatpush.bf16.msra.mxu1 %v352_v11 }
   0xe   :  { %112 = vmatpush.bf16.msra.mxu0 %v347_v3  ;;  %228 = vmatpush.bf16.msra.mxu2 %v356_v23 }
  0x10   :  { %173 = vmatpush.bf16.msra.mxu1 %v351_v12 }
  0x12   :  { %113 = vmatpush.bf16.msra.mxu0 %v346_v4  ;;  %229 = vmatpush.bf16.msra.mxu2 %v355_v24 }
  0x16   :  { %114 = vmatpush.bf16.msra.mxu0 %v345_v5 }
  0x1a   :  { %115 = vmatpush.bf16.msra.mxu0 %v344_v6 }
  0x1e   :  { %116 = vmatpush.bf16.msra.mxu0 %v343_v7 }
  0x21   :  { %117 = vmatmul.bf16.vlgmr.msra.gmra.mxu0 %v342_v8 }
  0x7d   :  { %v244_v45 = vpop.permute.xlu0 %243 }
  0x9e   :  { %v118_v13 = vpop.f32.mrf.mxu0 }
  0x9f   :  { %v119_v15 = vadd.f32 %v361_v14, %v118_v13 }
  0xa1   :  { %v123_v18 = vmax.f32 %v119_v15, 0.0 }
  0xa6   :  { %v120_v16 = vpop.f32.mrf.mxu0 }
  0xa7   :  { %v121_v17 = vadd.f32 %v361_v14, %v120_v16 }
  0xa9   :  { %v124_v19 = vmax.f32 %v121_v17, 0.0 }
  0xab   :  { %v125_v20 = vpack.c.bf16 %v124_v19, %v123_v18 }
  0xad   :  { %323 = vmatmul.msk.bf16.vlgmr.msra.gmra.mxu1 %vm162_vm0, %v125_v20 }
 0x12a   :  { %v175_v25 = vpop.f32.mrf.mxu1 }
 0x12b   :  { %v176_v27 = vadd.f32 %v362_v26, %v175_v25 }
 0x12d   :  { %v180_v30 = vmax.f32 %v176_v27, 0.0 }
 0x132   :  { %v177_v28 = vpop.f32.mrf.mxu1 }
 0x133   :  { %v178_v29 = vadd.f32 %v362_v26, %v177_v28 }
 0x135   :  { %v181_v31 = vmax.f32 %v178_v29, 0.0 }
 0x137   :  { %v182_v32 = vpack.c.bf16 %v181_v31, %v180_v30 }
 0x139   :  { %340 = vmatmul.msk.bf16.vlgmr.msra.gmra.mxu2 %vm162_vm0, %v182_v32 }
 0x1bc   :  { %v231_v35 = vpop.f32.mrf.mxu2 }
 0x1bd   :  { %v232_v37 = vadd.f32 %v363_v36, %v231_v35 }
 0x1bf   :  { %v236_v40 = vmax.f32 %v232_v37, 0.0 }
 0x1c4   :  { %v233_v38 = vpop.f32.mrf.mxu2 }
 0x1c5   :  { %v234_v39 = vadd.f32 %v363_v36, %v233_v38 }
 0x1c7   :  { %v237_v41 = vmax.f32 %v234_v39, 0.0 }
 0x1c9   :  { %v238_v42 = vpack.c.bf16 %v237_v41, %v236_v40 }
 0x1cb   :  { %v250_v43 = vsel %vm162_vm0, %v238_v42, 0 }
 0x1cc   :  { %259 = vmatpush.bf16.xpose.msra.mxu3 %v250_v43 }
 0x1d3   :  { %341 = vmatmul.msk.bf16.vlgmr.msra.gmra.mxu3 %vm162_vm0, %v239_v44 }
 0x256   :  { %v261_v46 = vpop.f32.mrf.mxu3 }
 0x257   :  { %v262_v47 = vadd.f32 %v261_v46, %v244_v45 }
 0x259   :  { %266 = vst.msk [vmem:[%s497_s9] sm:$0xff] %vm265_vm1, %v262_v47 }
 0x25e   :  { %v263_v48 = vpop.f32.mrf.mxu3 }

</bundles_post_ra>
